<compile_context>
chip_gen: v7x
topology: tpu7x:2x2x1
jax: 0.10.0
libtpu: 0.0.40
codegen_flags: <defaults>
</compile_context>

<pallas_src>
import functools

import jax
import jax.numpy as jnp
from jax.experimental import pallas as pl
from jax.experimental.pallas import tpu as pltpu

_NEG_FILL = -1.0e9  # sentinel PyTorch writes into masked positions


def _round_up(x: int, m: int) -> int:
    return ((x + m - 1) // m) * m


def _round_down(x: int, m: int) -> int:
    return (x // m) * m


def _masked_max_kernel(h_ref, m_ref, o_ref, *, seq_len: int, st: int, s_tail: bool):
    # h_ref: (St, Ht) native dtype; m_ref: (St, 1) native dtype; o_ref: (1, Ht).
    si = pl.program_id(2)

    @pl.when(si == 0)
    def _init():
        # -inf (not -1e9): a fully-unmasked row whose values are all < -1e9 must
        # still return its true max, exactly like the PyTorch reference.
        o_ref[...] = jnp.full(o_ref.shape, -jnp.inf, dtype=o_ref.dtype)

    h = h_ref[...]                                            # (St, Ht)
    valid = m_ref[...] != 0                                   # (St, 1), broadcasts on lanes
    h = jnp.where(valid, h, jnp.asarray(_NEG_FILL, h.dtype))
    if s_tail:
        # Ragged tail block: rows past the true sequence length hold garbage;
        # force them to -inf so they can never win the running max.
        row = si * st + jax.lax.broadcasted_iota(jnp.int32, (st, 1), 0)
        h = jnp.where(row < seq_len, h, jnp.asarray(-jnp.inf, h.dtype))
    partial = jnp.max(h, axis=0, keepdims=True)               # (1, Ht) sublane reduce
    o_ref[...] = jnp.maximum(o_ref[...], partial)             # running max over S tiles


def max_pooling(hidden_state: jax.Array, attention_mask: jax.Array, *,
                block_bytes: int = 8 << 20,
                vmem_limit_bytes: int = 48 << 20,
                st_cap: int | None = None,
                ht_cap: int | None = None) -> jax.Array:
    """hidden_state: [B, S, H] float dtype; attention_mask: [B, S] numeric. -> [B, H]."""
    B, S, H = hidden_state.shape
    dtype = hidden_state.dtype
    itemsize = jnp.dtype(dtype).itemsize
    sub = max(8, 32 // itemsize)            # sublane packing: 8 f32 / 16 bf16 / 32 int8

    # ---- lane (H) tile: prefer full H (one contiguous HBM slab per block) ----
    Ht = H
    if B == 1 and H >= 256:
        # Guarantee >= 2 parallel grid blocks so both v7x TensorCores stream.
        Ht = min(Ht, _round_up(pl.cdiv(H, 2), 128))
    if ht_cap is not None:
        Ht = min(Ht, ht_cap)
    if Ht < H:
        Ht = max(128, _round_down(Ht, 128))
    # Shrink further only if even a minimum-height block would blow the budget.
    if sub * Ht * itemsize > block_bytes and Ht > 128:
        Ht = max(128, _round_down(block_bytes // (sub * itemsize), 128))
    if Ht >= H:
        Ht = H

    # ---- sublane (S) tile: fill the per-block byte budget ----
    # The mask's (St, 1) block is lane-padded to 128 lanes; account for it.
    row_bytes = Ht * itemsize + 128 * itemsize
    St = max(sub, _round_down(block_bytes // row_bytes, sub))
    if st_cap is not None:
        St = min(St, max(sub, _round_down(st_cap, sub)))
    if St >= S:
        St = S                               # full-extent block: no divisibility needed

    n_h = pl.cdiv(H, Ht)
    n_s = pl.cdiv(S, St)
    s_tail = (St < S) and (S % St != 0)

    # Mask in hidden's dtype: matches its sublane packing, cheap DMA, exact 0/1.
    mask = (attention_mask != 0).astype(dtype).reshape(B, S, 1)

    kernel = functools.partial(_masked_max_kernel, seq_len=S, st=St, s_tail=s_tail)

    grid = (B, n_h, n_s)                     # reduction axis (S) innermost / "arbitrary"
    out = pl.pallas_call(
        kernel,
        out_shape=jax.ShapeDtypeStruct((B, 1, H), dtype),
        grid=grid,
        in_specs=[
            # None squeezes the batch dim out of the kernel-visible block.
            pl.BlockSpec((None, St, Ht), lambda b, hi, si: (b, si, hi)),
            pl.BlockSpec((None, St, 1), lambda b, hi, si: (b, si, 0)),
        ],
        # Same block index for every si -> output stays resident in VMEM (accumulator).
        out_specs=pl.BlockSpec((None, 1, Ht), lambda b, hi, si: (b, 0, hi)),
        compiler_params=pltpu.CompilerParams(
            dimension_semantics=("parallel", "parallel", "arbitrary"),
            vmem_limit_bytes=vmem_limit_bytes),
    )(hidden_state, mask)
    return out.reshape(B, H)


def _reference(hidden_state, attention_mask):
    # Pure-JAX reference mirroring the PyTorch forward.
    valid = (attention_mask != 0)[:, :, None]
    h = jnp.where(valid, hidden_state, jnp.asarray(_NEG_FILL, hidden_state.dtype))
    return jnp.max(h, axis=1)


if __name__ == "__main__":
    key = jax.random.PRNGKey(0)
    k1, k2, k3 = jax.random.split(key, 3)

    # Test 1: small f32 problem (single full-H block per batch row).
    B, S, H = 2, 8, 32
    hs = jax.random.normal(k1, (B, S, H), dtype=jnp.float32)
    lengths = jnp.array([S, S // 2], dtype=jnp.int32)
    am = (jnp.arange(S)[None, :] < lengths[:, None]).astype(jnp.float32)
    out = jax.block_until_ready(max_pooling(hs, am))
    ref = _reference(hs, am)
    assert out.shape == (B, H) and out.dtype == hs.dtype
    assert jnp.array_equal(out, ref), "mismatch vs reference (f32)"

    # Test 2: bf16, multiple S tiles with a ragged tail (24 = 16 + 8) and a fully
    # masked row (must come out as exactly -1e9, like the PyTorch in-place fill).
    B2, S2, H2 = 2, 24, 128
    hs2 = jax.random.normal(k2, (B2, S2, H2), dtype=jnp.float32).astype(jnp.bfloat16)
    lengths2 = jnp.array([S2, 0], dtype=jnp.int32)
    am2 = (jnp.arange(S2)[None, :] < lengths2[:, None]).astype(jnp.int32)
    out2 = jax.block_until_ready(max_pooling(hs2, am2, st_cap=16))
    ref2 = _reference(hs2, am2)
    assert out2.dtype == jnp.bfloat16
    assert jnp.array_equal(out2.astype(jnp.float32), ref2.astype(jnp.float32)), \
        "mismatch vs reference (bf16, ragged S tiles)"

    # Test 3: B == 1 with H split into two 128-lane tiles (v7x two-TC parallel path).
    B3, S3, H3 = 1, 16, 256
    hs3 = jax.random.normal(k3, (B3, S3, H3), dtype=jnp.float32)
    am3 = (jnp.arange(S3)[None, :] < 5).astype(jnp.float32)
    out3 = jax.block_until_ready(max_pooling(hs3, am3))
    ref3 = _reference(hs3, am3)
    assert jnp.array_equal(out3, ref3), "mismatch vs reference (B=1, split H)"

    print("KERNEL_OK")
</pallas_src>

<mosaic_0001>
module attributes {stable_mosaic.version = 11 : i64} {
  func.func @_masked_max_kernel(%arg0: i32, %arg1: i32, %arg2: i32, %arg3: memref<1x8x32xf32, #tpu.memory_space<vmem>>, %arg4: memref<1x8x1xf32, #tpu.memory_space<vmem>>, %arg5: memref<1x1x32xf32, #tpu.memory_space<vmem>>) attributes {dimension_semantics = [#tpu.dimension_semantics<parallel>, #tpu.dimension_semantics<parallel>, #tpu.dimension_semantics<arbitrary>], iteration_bounds = array<i64: 2, 1, 1>, scalar_prefetch = 0 : i64, scratch_operands = 0 : i64, tpu.core_type = #tpu.core_type<tc>, window_params = [{transform_indices = @transform_0, window_bounds = array<i64: 1, 8, 32>}, {transform_indices = @transform_1, window_bounds = array<i64: 1, 8, 1>}, {transform_indices = @transform_2, window_bounds = array<i64: 1, 1, 32>}]} {
    %c0_i32 = arith.constant 0 : i32
    %0 = arith.cmpi eq, %arg2, %c0_i32 : i32
    %1 = arith.extui %0 : i1 to i32
    %c0_i32_0 = arith.constant 0 : i32
    %2 = arith.cmpi ne, %1, %c0_i32_0 : i32
    scf.if %2 {
      %cst_14 = arith.constant 0xFF800000 : f32
      %21 = vector.broadcast %cst_14 : f32 to vector<1x32xf32>
      %c0_15 = arith.constant 0 : index
      %c0_16 = arith.constant 0 : index
      %c0_17 = arith.constant 0 : index
      %22 = vector.load %arg5[%c0_15, %c0_16, %c0_17] : memref<1x1x32xf32, #tpu.memory_space<vmem>>, vector<1x1x32xf32>
      %23 = vector.shape_cast %22 : vector<1x1x32xf32> to vector<1x32xf32>
      %24 = vector.shape_cast %21 : vector<1x32xf32> to vector<1x1x32xf32>
      tpu.vector_store %arg5[%c0_15, %c0_16, %c0_17], %24 {strides = array<i32>} : memref<1x1x32xf32, #tpu.memory_space<vmem>>, vector<1x1x32xf32>,
    } else {
    }
    %c0 = arith.constant 0 : index
    %c0_1 = arith.constant 0 : index
    %c0_2 = arith.constant 0 : index
    %3 = vector.load %arg3[%c0, %c0_1, %c0_2] : memref<1x8x32xf32, #tpu.memory_space<vmem>>, vector<1x8x32xf32>
    %4 = vector.shape_cast %3 : vector<1x8x32xf32> to vector<8x32xf32>
    %c0_3 = arith.constant 0 : index
    %c0_4 = arith.constant 0 : index
    %c0_5 = arith.constant 0 : index
    %5 = vector.load %arg4[%c0_3, %c0_4, %c0_5] : memref<1x8x1xf32, #tpu.memory_space<vmem>>, vector<1x8x1xf32>
    %6 = vector.shape_cast %5 : vector<1x8x1xf32> to vector<8x1xf32>
    %cst = arith.constant 0.000000e+00 : f32
    %7 = vector.broadcast %cst : f32 to vector<8x1xf32>
    %8 = arith.cmpf one, %6, %7 : vector<8x1xf32>
    %cst_6 = arith.constant -1.000000e+09 : f32
    %9 = vector.shape_cast %8 : vector<8x1xi1> to vector<8x1xi1>
    %10 = vector.broadcast %9 : vector<8x1xi1> to vector<8x32xi1>
    %11 = vector.broadcast %cst_6 : f32 to vector<8x32xf32>
    %12 = arith.select %10, %4, %11 : vector<8x32xi1>, vector<8x32xf32>
    %cst_7 = arith.constant dense<0xFF800000> : vector<32xf32>
    %13 = vector.multi_reduction <maximumf>, %12, %cst_7 [0] : vector<8x32xf32> to vector<32xf32>
    %14 = vector.shape_cast %13 : vector<32xf32> to vector<1x32xf32>
    %c0_8 = arith.constant 0 : index
    %c0_9 = arith.constant 0 : index
    %c0_10 = arith.constant 0 : index
    %15 = vector.load %arg5[%c0_8, %c0_9, %c0_10] : memref<1x1x32xf32, #tpu.memory_space<vmem>>, vector<1x1x32xf32>
    %16 = vector.shape_cast %15 : vector<1x1x32xf32> to vector<1x32xf32>
    %17 = arith.maximumf %16, %14 : vector<1x32xf32>
    %c0_11 = arith.constant 0 : index
    %c0_12 = arith.constant 0 : index
    %c0_13 = arith.constant 0 : index
    %18 = vector.load %arg5[%c0_11, %c0_12, %c0_13] : memref<1x1x32xf32, #tpu.memory_space<vmem>>, vector<1x1x32xf32>
    %19 = vector.shape_cast %18 : vector<1x1x32xf32> to vector<1x32xf32>
    %20 = vector.shape_cast %17 : vector<1x32xf32> to vector<1x1x32xf32>
    tpu.vector_store %arg5[%c0_11, %c0_12, %c0_13], %20 {strides = array<i32>} : memref<1x1x32xf32, #tpu.memory_space<vmem>>, vector<1x1x32xf32>,
    return
  }
  func.func @transform_0(%arg0: i32, %arg1: i32, %arg2: i32) -> (i32, i32, i32) {
    %c0_i32 = arith.constant 0 : i32
    return %arg0, %arg2, %arg1 : i32, i32, i32
  }
  func.func @transform_1(%arg0: i32, %arg1: i32, %arg2: i32) -> (i32, i32, i32) {
    %c0_i32 = arith.constant 0 : i32
    %c0_i32_0 = arith.constant 0 : i32
    return %arg0, %arg2, %c0_i32 : i32, i32, i32
  }
  func.func @transform_2(%arg0: i32, %arg1: i32, %arg2: i32) -> (i32, i32, i32) {
    %c0_i32 = arith.constant 0 : i32
    %c0_i32_0 = arith.constant 0 : i32
    return %arg0, %c0_i32, %arg1 : i32, i32, i32
  }
}

</mosaic_0001>

<bundles_post_ra>
// kernel: tpu_custom_call.1
= control target key start
LH: loop header
LB: loop body
LE: loop exit
PB: predicated region body
PF: predicated region fallthrough
CT: control target
= control target key end

     0   :  { %7 = vsyncpa [#allocation3], 0  ;;  %s621_s0 = inlined_call_operand.vmem [shape: f32[2,8,32], index: 0, kind: input, shape index: {}]   ;;  %s622_s1 = inlined_call_operand.vmem [shape: f32[2,8,1], index: 1, kind: input, shape index: {}]   ;;  %s623_s2 = inlined_call_operand.hbm [shape: f32[2,1,32], index: 2, kind: output, shape index: {}]  }
   0x1   :  { %9 = vsyncpa [#allocation3 + $0x1], 0  ;;  %s504_s9 = smov 0   ;;  %s506_s10 = smov 0  }
   0x2   :  { %s508_s11 = smov 0   ;;  %s510_s12 = smov 0  }
   0x3   :  { %s512_s13 = smov 0   ;;  %s514_s14 = smov 0  }
   0x4 LB: > { %s338_s15 = sadd.s32 4294967295, %s484_s14   ;;  %s339_s16 = sadd.s32 4294967294, %s484_s14   ;;  %s484_s14 = sphi %s514_s14, %s15_s14   ;;  %s480_s13 = sphi %s512_s13, %s630_s13   ;;  %s476_s12 = sphi %s510_s12, %s629_s12   ;;  %s472_s11 = sphi %s508_s11, %s628_s11   ;;  %s468_s10 = sphi %s506_s10, %s627_s10   ;;  %s464_s9 = sphi %s504_s9, %s626_s9  }
   0x5   : > { %s34_s17 = sadd.s32 1, %s480_s13  ;;  %s101_s18 = sadd.s32 1, %s472_s11 }
   0x6   : > { %p36_p0 = scmp.ge.s32.totalorder %s34_s17, 2  ;;  %p111_p1 = scmp.ne.s32.totalorder %s472_s11, %s468_s10 }
   0x7   : > { %p112_p2 = scmp.eq.s32.totalorder %s338_s15, 1  ;;  %p117_p3 = scmp.ne.s32.totalorder %s468_s10, %s464_s9 }
   0x8   : > { %s632_s17 = smov (%p36_p0, %s34_s17), 0  ;;  %p118_p5 = scmp.eq.s32.totalorder %s339_s16, 1 }
   0x9   : > { %p544_p4 = por %p112_p2, %p111_p1  ;;  %s96_s20 = ssub.s32 %s480_s13, %s632_s17 }
   0xa   : > { %p342_p6 = scmp.ge.s32.totalorder %s484_s14, 1  ;;  %p99_p7 = scmp.eq.s32.totalorder %s96_s20, 0 }
   0xb   : > { %p551_p8 = por %p118_p5, %p117_p3  ;;  %p159_p9 = scmp.lt.s32.totalorder %s484_s14, 3 }
   0xc   : > { %s557_s22 = scalar_select %p99_p7, %s472_s11, %s101_s18  }
   0xd   : > { %p160_p10 = pnand %p342_p6, %p159_p9 }
   0xe   : > { %p192_p11 = scmp.lt.s32.totalorder (!%p160_p10), %s476_s12, 1  ;;  %v486_v0 = vmov (!%p160_p10), 0   ;;  %s190_s28 = sand.u32 (!%p160_p10), 1, %s468_s10   ;;  %vm213_vm1 = vcmask (!%p160_p10), 253952   ;;  %v487_v3 = vmov (!%p160_p10), -inf   ;;  %vm224_vm2 = vcmask (!%p160_p10), 261120  }
   0xf   : > { %163 = sbr.rel (%p160_p10) target bundleno = 188 (0xbc), region = 28  ;;  %405 = vset.pattern.permute.xlu0 (!%p160_p10), %v486_v0  ;;  %s191_s29 = scalar_lea.vmem (!%p160_p10), [#allocation2], %s190_s28 }
  0x10   : > { %214 = vst.msk [vmem:[%s191_s29] sm:$0x1] (!%p160_p10), %vm213_vm1, %v487_v3  ;;  %s345_s5 = sshll.u32 (!%p160_p10), %s476_s12, 4  ;;  %s250_s6 = sshll.u32 (!%p160_p10), %s191_s29, 4  ;;  %s575_s6 = int_to_ptr.vmem [resolvable:$true] %s250_s6 }
  0x11   : > { %s573_s15 = scalar_lea.hbm (!%p160_p10), %s623_s2, %s345_s5  ;;  %s237_s16 = scalar_lea.sflag (!%p160_p10), [#allocation3], %s190_s28 }
  0x12   : > { %s406_s18 = scalar_lea.vmem (!%p160_p10), %s575_s6, 16 }
  0x13   : > { %p407_p12 = scmp.ne.s32.totalorder (!%p160_p10), %s575_s6, %s406_s18 }
  0x15   : > { %p408_p13 = pnand (!%p160_p10), %p407_p12, %p544_p4 }
  0x16   : > { %s193_s23 = scalar_select %p192_p11, %s476_s12, 1 }
  0x17   : > { %v232_v13 = vld [vmem:[%s191_s29] sm:$0x1]  ;;  %p409_p0 = pneg %p408_p13  ;;  %s488_s12 = smov [#allocation2]  }
  0x18   : > { %s343_s24 = sshll.u32 %s193_s23, 3  ;;  %s410_s20 = sshll.u32 %s488_s12, 4  ;;  %s411_s20 = int_to_ptr.vmem [resolvable:$false] %s410_s20 }
  0x19   : > { %s208_s27 = scalar_lea.vmem %s622_s1, %s343_s24  ;;  %s201_s4 = scalar_lea.vmem %s621_s0, %s343_s24 }
  0x1a   : > { %v216_v1 = vld [vmem:[%s208_s27] sm:$0xff]  ;;  %s412_s23 = scalar_lea.vmem %s411_s20, 32  ;;  %p413_p1 = scmp.lt.s32.totalorder %s575_s6, %s411_s20 }
  0x1b   : > { %vm217_vm0 = vcmp.ne.f32.partialorder %v216_v1, 0.0  ;;  %v215_v4 = vld [vmem:[%s201_s4] sm:$0xff]  ;;  %p414_p2 = scmp.lt.s32.totalorder %s412_s23, %s406_s18 }
  0x1c   : > { %v218_v2 = vsel %vm217_vm0, 1, %v486_v0 }
  0x1d   : > { %220 = vperm.xlu0 %405, %v218_v2   ;;  %p415_p3 = por %p414_p2, %p413_p1 }
  0x1f   : > { %p416_p5 = pnand %p415_p3, %p409_p0 }
  0x9c   : > { %v221_v5 = vpop.permute.xlu0 %220 }
  0x9d   : > { %vm222_vm3 = vcmp.eq.s32.totalorder %v221_v5, 1 }
  0x9e   : > { %v223_v6 = vsel %vm222_vm3, %v215_v4, -1e+09 }
  0x9f   : > { %v225_v7 = vsel %vm224_vm2, %v223_v6, -inf }
  0xa0   : > { %v226_v8 = vrot.slane %v225_v7, 4 }
  0xa2   : > { %v227_v9 = vmax.f32 %v225_v7, %v226_v8 }
  0xa4   : > { %v228_v10 = vrot.slane %v227_v9, 2 }
  0xa6   : > { %v229_v11 = vmax.f32 %v227_v9, %v228_v10 }
  0xa8   : > { %v230_v12 = vrot.slane %v229_v11, 1 }
  0xaa   : > { %v231_v14 = vmax.f32 %v229_v11, %v230_v12 }
  0xac   : > { %v233_v15 = vmax.f32 %v232_v13, %v231_v14 }
  0xae   : > { %235 = vst.msk [vmem:[%s191_s29] sm:$0x1] %vm213_vm1, %v233_v15 }
  0xaf   : > { %419 = shalt.err (!%p416_p5)
}
  0xb0   : > { %s420_s24 = scalar_lea.hbm %s573_s15, 16  ;;  %s424_s27 = scalar_lea.hbm %s623_s2, 32 }
  0xb1   : > { %p421_p6 = scmp.ne.s32.totalorder %s573_s15, %s420_s24  ;;  %p425_p10 = scmp.lt.u32.totalorder %s573_s15, %s623_s2 }
  0xb2   : > { %p426_p11 = scmp.lt.u32.totalorder %s424_s27, %s420_s24  ;;  %p428_p13 = scmp.lt.u32.totalorder %s420_s24, %s573_s15 }
  0xb3   : > { %p422_p7 = pnand %p421_p6, %p544_p4 }
  0xb4   : > { %p427_p12 = por %p426_p11, %p425_p10 }
  0xb5   : > { %p423_p9 = pneg %p422_p7 }
  0xb6   : > { %p429_p0 = por %p428_p13, %p427_p12 }
  0xb8   : > { %p430_p1 = pnand %p429_p0, %p423_p9 }
  0xba   : > { %433 = shalt.err (!%p430_p1)
}
  0xbb   : > { %348 = dma.vmem_to_hbm [thread:$0]  (%p544_p4), %s575_s6, 16, %s573_s15, %s237_s16  }
  0xbc PF: > { %p354_p2 = scmp.ge.s32.totalorder %s484_s14, 2  ;;  %s262_s30 = sand.u32 1, %s464_s9  }
  0xbd   : > { %s263_s3 = scalar_lea.sflag [#allocation3], %s262_s30 }
  0xbe   : > { %p351_p3 = pnand %p354_p2, %p551_p8 }
  0xc0   : > { %459 = dma.done.wait (!%p351_p3), %s263_s3, 16  }
  0xc1   : > { %461 = vsyncadd (!%p351_p3), %s263_s3, 4294967280  ;;  %s15_s14 = sadd.s32 1, %s484_s14   ;;  %s626_s9 = smov %s468_s10 }
  0xc2   : > { %p12_p5 = scmp.ge.s32.totalorder %s15_s14, 4   ;;  %s627_s10 = smov %s472_s11 }
  0xc3   : > { %s628_s11 = smov %s557_s22  ;;  %s629_s12 = smov %s480_s13 }
  0xc4   : > { %s630_s13 = smov %s632_s17  ;;  %14 = sbr.rel (!%p12_p5) target bundleno = 4 (0x4), region = 70 }
  0xcb   :  { %267 = vsyncpa [#allocation3], 1 }
  0xcc   :  { %269 = vsyncpa [#allocation3 + $0x1], 1 }

</bundles_post_ra>
